<compile_context>
chip_gen: v6e
topology: v6e:2x2x1
jax: 0.10.0
libtpu: 0.0.40
codegen_flags: <defaults>
</compile_context>

<pallas_src>
import functools

import jax
import jax.numpy as jnp
from jax import lax
from jax.experimental import pallas as pl
from jax.experimental.pallas import tpu as pltpu

_HIDDEN = 10  # fc1/fc2 width from the PyTorch module


def _round_up(n, m):
    return ((n + m - 1) // m) * m


def _mlp_kernel(x_ref, w_ref, c_ref, o_ref, *, n_features):
    """x_ref: [TILE_B, F] input tile in its native (batch-major) layout.
    w_ref:  [16, Cw] bf16 slab holding w1.T | w2.T (resident in VMEM).
    c_ref:  [16, 128] f32 slab holding b1 | b2 | w3 | b3 columns (resident).
    o_ref:  [1, TILE_B] lane-dense output row."""
    F, H = n_features, _HIDDEN

    x = x_ref[...]                                   # [TILE_B, F]
    if x.dtype != jnp.bfloat16:                      # only cast when input is f32
        x = x.astype(jnp.bfloat16)

    w1t = w_ref[0:H, 0:F]                            # [H, F]  bf16 (== w1.T)
    w2t = w_ref[0:H, F:F + H]                        # [H, H]  bf16 (== w2.T)
    b1 = c_ref[0:H, 0:1]                             # [H, 1]  f32
    b2 = c_ref[0:H, 1:2]                             # [H, 1]  f32
    w3 = c_ref[0:H, 2:3]                             # [H, 1]  f32
    b3 = c_ref[0:1, 3:4]                             # [1, 1]  f32

    # fc1: contract on F with x kept in its native layout (rhs-contracted);
    # result [H, TILE_B] is lane-dense in the batch. MXU, f32 accumulation.
    h1 = lax.dot_general(w1t, x, dimension_numbers=(((1,), (1,)), ((), ())),
                         preferred_element_type=jnp.float32) + b1
    h1 = jnp.maximum(h1, 0.0)                        # [H, TILE_B]

    h2 = jnp.dot(w2t, h1.astype(jnp.bfloat16),
                 preferred_element_type=jnp.float32) + b2
    h2 = jnp.maximum(h2, 0.0)                        # [H, TILE_B]

    # fc3 (output width 1): VPU multiply + sublane (XLU) reduce, no MXU pass.
    h3 = jnp.sum(h2 * w3, axis=0, keepdims=True) + b3   # [1, TILE_B]

    o_ref[...] = h3.astype(o_ref.dtype)


def _pack_params(params, n_features):
    """Pack params into two tiny resident slabs: bf16 weights, f32 biases/w3."""
    F, H = n_features, _HIDDEN

    # Weights as bf16 (the MXU consumes bf16 anyway; packing once removes the
    # per-step in-kernel casts and halves the resident-slab DMA).
    w1t = params["w1"].T.astype(jnp.bfloat16)              # [H, F]
    w2t = params["w2"].T.astype(jnp.bfloat16)              # [H, H]
    w = jnp.concatenate([w1t, w2t], axis=1)                # [H, F+H]
    w_rows = _round_up(H, 16)                              # bf16 sublane packing
    w_cols = _round_up(F + H, 128)
    w = jnp.pad(w, ((0, w_rows - H), (0, w_cols - (F + H))))

    # Biases + fc3 column stay f32 (bias add / ReLU / fc3 reduce run in f32).
    b1 = params["b1"].reshape(H, 1).astype(jnp.float32)
    b2 = params["b2"].reshape(H, 1).astype(jnp.float32)
    w3 = params["w3"].reshape(H, 1).astype(jnp.float32)
    b3 = jnp.broadcast_to(params["b3"].reshape(1, 1), (H, 1)).astype(jnp.float32)
    c = jnp.concatenate([b1, b2, w3, b3], axis=1)          # [H, 4]
    c = jnp.pad(c, ((0, _round_up(H, 8) - H), (0, 128 - 4)))
    return w, c


def _choose_tile_b(B, F, x_itemsize, slab_bytes, requested=None):
    """Batch-tile width + explicit scoped-VMEM limit, per TPU generation."""
    try:
        vmem_cap = int(pltpu.get_tpu_info().vmem_capacity_bytes)
    except Exception:
        vmem_cap = 64 << 20    # conservative fallback (v7x per-TensorCore VMEM)

    if requested is not None:
        tile_b = _round_up(max(128, requested), 128)
    else:
        # Target >= ~1 MiB of x per grid step so the ~0.35 us per-step overhead
        # is amortized (>=85% of HBM roofline vs ~30% for tiny blocks).
        target = (1 << 20) // max(1, x_itemsize * F)
        tile_b = _round_up(max(128, target), 128)

    # Don't make the tile bigger than the (rounded-up) batch.
    tile_b = min(tile_b, _round_up(B, 128))

    # v7x megacore: keep >= 2 grid steps when the batch is big enough so
    # dimension_semantics=("parallel",) can shard across both TensorCores.
    if requested is None and B >= 256 and tile_b >= B:
        tile_b = _round_up(pl.cdiv(B, 2), 128)

    # VMEM clamp (v7x: 64 MiB per TC vs 128 MiB on v5e/v6e): double-buffered
    # x tile + f32 output row + resident slabs must fit with headroom.
    budget = int(0.45 * vmem_cap)
    per_col = 2 * x_itemsize * F + 2 * 4
    max_cols = max(128, ((budget - 2 * slab_bytes) // per_col) // 128 * 128)
    tile_b = min(tile_b, max_cols)

    # Explicit scoped-VMEM limit: the 16/32 MiB defaults (v5e / v6e,v7x), not
    # physical VMEM, would otherwise be the binding ceiling for large F.
    used = per_col * tile_b + 2 * slab_bytes + (2 << 20)
    vmem_limit = int(min(max(used, 32 << 20), 0.75 * vmem_cap))
    return tile_b, vmem_limit


def neural_net_forward(x, params, *, tile_b=None):
    """x: [B, F] float32 or bfloat16 (bf16 input halves the dominant HBM stream).
    params: w1 [F,10], b1 [1,10], w2 [10,10], b2 [1,10], w3 [10,1], b3 [1,1].
    Returns [B, 1] float32, matching PyTorch NeuralNet.forward."""
    x = jnp.asarray(x)
    if x.dtype != jnp.float32 and x.dtype != jnp.bfloat16:
        x = x.astype(jnp.float32)
    B, F = x.shape

    w_slab, c_slab = _pack_params(params, F)
    slab_bytes = w_slab.nbytes + c_slab.nbytes
    tile_b, vmem_limit = _choose_tile_b(B, F, x.dtype.itemsize, slab_bytes, tile_b)

    grid_b = pl.cdiv(B, tile_b)
    out_cols = grid_b * tile_b  # pad only the tiny output so every store stays
                                # an unmasked full-width lane-dense vst.

    flops = 2 * B * (_HIDDEN * F + _HIDDEN * _HIDDEN + _HIDDEN)
    bytes_accessed = x.dtype.itemsize * B * F + 4 * out_cols + slab_bytes

    out_row = pl.pallas_call(
        functools.partial(_mlp_kernel, n_features=F),
        out_shape=jax.ShapeDtypeStruct((1, out_cols), jnp.float32),
        grid=(grid_b,),
        in_specs=[
            # x streamed in its native [B, F] layout (no wrapper transpose or
            # pad): new batch block each step, auto double-buffered DMA. The
            # overhanging tail of the last block reads padding, but each output
            # column depends only on its own input column and the tail is
            # sliced off after the call.
            pl.BlockSpec((tile_b, F), lambda i: (i, 0)),
            # Packed params: constant block index -> DMA'd once, stay resident.
            pl.BlockSpec(w_slab.shape, lambda i: (0, 0)),
            pl.BlockSpec(c_slab.shape, lambda i: (0, 0)),
        ],
        out_specs=pl.BlockSpec((1, tile_b), lambda i: (0, i)),
        compiler_params=pltpu.CompilerParams(
            dimension_semantics=("parallel",),
            vmem_limit_bytes=vmem_limit),
        cost_estimate=pl.CostEstimate(
            flops=flops, transcendentals=0, bytes_accessed=bytes_accessed),
    )(x, w_slab, c_slab)

    return out_row[0, :B].reshape(B, 1)


def init_params(key, in_features):
    """Deterministic init mimicking PyTorch Linear's U(-1/sqrt(fan_in), 1/sqrt(fan_in))."""
    def linear(key, fan_in, fan_out):
        kw, kb = jax.random.split(key)
        bound = 1.0 / jnp.sqrt(jnp.float32(fan_in))
        w = jax.random.uniform(kw, (fan_in, fan_out), jnp.float32, -bound, bound)
        b = jax.random.uniform(kb, (1, fan_out), jnp.float32, -bound, bound)
        return w, b

    k1, k2, k3 = jax.random.split(key, 3)
    w1, b1 = linear(k1, in_features, _HIDDEN)
    w2, b2 = linear(k2, _HIDDEN, _HIDDEN)
    w3, b3 = linear(k3, _HIDDEN, 1)
    return {"w1": w1, "b1": b1, "w2": w2, "b2": b2, "w3": w3, "b3": b3}


def _reference_f32(x, p):
    """Exact PyTorch-semantics (f32) forward."""
    x = jnp.asarray(x, jnp.float32)
    h1 = jnp.maximum(x @ p["w1"] + p["b1"], 0.0)
    h2 = jnp.maximum(h1 @ p["w2"] + p["b2"], 0.0)
    return h2 @ p["w3"] + p["b3"]


def _reference_bf16(x, p):
    """Reference with the same bf16 MXU-input / f32-accumulate precision as the kernel."""
    x = jnp.asarray(x, jnp.float32)

    def bdot(a, b):
        return jnp.dot(a.astype(jnp.bfloat16), b.astype(jnp.bfloat16),
                       preferred_element_type=jnp.float32)

    h1 = jnp.maximum(bdot(x, p["w1"]) + p["b1"], 0.0)
    h2 = jnp.maximum(bdot(h1, p["w2"]) + p["b2"], 0.0)
    return h2 @ p["w3"] + p["b3"]


if __name__ == "__main__":
    key = jax.random.PRNGKey(0)
    kx, kp, kx2, kp2 = jax.random.split(key, 4)

    # --- Primary small check: B=8, F=8 (F stands in for X.shape[1]) ---------
    B, F = 8, 8
    x = jax.random.uniform(kx, (B, F), jnp.float32)   # MinMax-scaled-like inputs
    params = init_params(kp, F)

    out = jax.block_until_ready(neural_net_forward(x, params))
    assert out.shape == (B, 1)
    assert jnp.allclose(out, _reference_bf16(x, params), atol=5e-3, rtol=5e-3)
    assert jnp.allclose(out, _reference_f32(x, params), atol=5e-2, rtol=5e-2)

    # --- Non-multiple batch + forced multi-tile grid (overhanging last block) --
    B2, F2 = 300, 13
    x2 = jax.random.uniform(kx2, (B2, F2), jnp.float32)
    params2 = init_params(kp2, F2)

    out2 = jax.block_until_ready(neural_net_forward(x2, params2, tile_b=128))
    assert out2.shape == (B2, 1)
    assert jnp.allclose(out2, _reference_bf16(x2, params2), atol=5e-3, rtol=5e-3)
    assert jnp.allclose(out2, _reference_f32(x2, params2), atol=5e-2, rtol=5e-2)

    # --- Auto tile sizing (>=2 grid steps) + bf16 input (halved HBM stream) ---
    x2_bf16 = x2.astype(jnp.bfloat16)
    out3 = jax.block_until_ready(neural_net_forward(x2_bf16, params2))
    assert out3.shape == (B2, 1)
    assert jnp.allclose(out3,
                        _reference_bf16(x2_bf16.astype(jnp.float32), params2),
                        atol=1e-2, rtol=1e-2)

    print("KERNEL_OK")
</pallas_src>

<mosaic_0001>
module attributes {stable_mosaic.version = 11 : i64} {
  func.func @_mlp_kernel(%arg0: i32, %arg1: memref<128x8xf32, #tpu.memory_space<vmem>>, %arg2: memref<16x128xbf16, #tpu.memory_space<vmem>>, %arg3: memref<16x128xf32, #tpu.memory_space<vmem>>, %arg4: memref<1x128xf32, #tpu.memory_space<vmem>>) attributes {dimension_semantics = [#tpu.dimension_semantics<parallel>], iteration_bounds = array<i64: 1>, scalar_prefetch = 0 : i64, scratch_operands = 0 : i64, tpu.core_type = #tpu.core_type<tc>, window_params = [{transform_indices = @transform_0, window_bounds = array<i64: 128, 8>}, {pipeline_mode = #tpu.pipeline_mode<synchronous>, transform_indices = @transform_1, window_bounds = array<i64: 16, 128>}, {pipeline_mode = #tpu.pipeline_mode<synchronous>, transform_indices = @transform_2, window_bounds = array<i64: 16, 128>}, {transform_indices = @transform_3, window_bounds = array<i64: 1, 128>}]} {
    %c0 = arith.constant 0 : index
    %c0_0 = arith.constant 0 : index
    %0 = vector.load %arg1[%c0, %c0_0] : memref<128x8xf32, #tpu.memory_space<vmem>>, vector<128x8xf32>
    %1 = arith.truncf %0 : vector<128x8xf32> to vector<128x8xbf16>
    %c0_1 = arith.constant 0 : index
    %c0_2 = arith.constant 0 : index
    %2 = vector.load %arg2[%c0_1, %c0_2] : memref<16x128xbf16, #tpu.memory_space<vmem>>, vector<10x8xbf16>
    %c0_3 = arith.constant 0 : index
    %c8 = arith.constant 8 : index
    %3 = vector.load %arg2[%c0_3, %c8] : memref<16x128xbf16, #tpu.memory_space<vmem>>, vector<10x10xbf16>
    %c0_4 = arith.constant 0 : index
    %c0_5 = arith.constant 0 : index
    %4 = vector.load %arg3[%c0_4, %c0_5] : memref<16x128xf32, #tpu.memory_space<vmem>>, vector<10x1xf32>
    %c0_6 = arith.constant 0 : index
    %c1 = arith.constant 1 : index
    %5 = vector.load %arg3[%c0_6, %c1] : memref<16x128xf32, #tpu.memory_space<vmem>>, vector<10x1xf32>
    %c0_7 = arith.constant 0 : index
    %c2 = arith.constant 2 : index
    %6 = vector.load %arg3[%c0_7, %c2] : memref<16x128xf32, #tpu.memory_space<vmem>>, vector<10x1xf32>
    %c0_8 = arith.constant 0 : index
    %c3 = arith.constant 3 : index
    %7 = vector.load %arg3[%c0_8, %c3] : memref<16x128xf32, #tpu.memory_space<vmem>>, vector<1x1xf32>
    %cst = arith.constant dense<0.000000e+00> : vector<10x128xf32>
    %8 = tpu.matmul %2, %1, %cst {dimension_numbers = #tpu.dot_dimension_numbers<[1], [1], [0], [0], [0, 0, 1, 0], [], []>} : vector<10x8xbf16>, vector<128x8xbf16>, vector<10x128xf32> -> vector<10x128xf32>
    %9 = vector.broadcast %4 : vector<10x1xf32> to vector<10x128xf32>
    %10 = arith.addf %8, %9 : vector<10x128xf32>
    %cst_9 = arith.constant 0.000000e+00 : f32
    %11 = vector.broadcast %cst_9 : f32 to vector<10x128xf32>
    %12 = arith.maximumf %10, %11 : vector<10x128xf32>
    %13 = arith.truncf %12 : vector<10x128xf32> to vector<10x128xbf16>
    %cst_10 = arith.constant dense<0.000000e+00> : vector<10x128xf32>
    %14 = tpu.matmul %3, %13, %cst_10 {dimension_numbers = #tpu.dot_dimension_numbers<[1], [0], [0], [1], [0, 0, 1, 1], [], []>} : vector<10x10xbf16>, vector<10x128xbf16>, vector<10x128xf32> -> vector<10x128xf32>
    %15 = vector.broadcast %5 : vector<10x1xf32> to vector<10x128xf32>
    %16 = arith.addf %14, %15 : vector<10x128xf32>
    %cst_11 = arith.constant 0.000000e+00 : f32
    %17 = vector.broadcast %cst_11 : f32 to vector<10x128xf32>
    %18 = arith.maximumf %16, %17 : vector<10x128xf32>
    %19 = vector.broadcast %6 : vector<10x1xf32> to vector<10x128xf32>
    %20 = arith.mulf %18, %19 : vector<10x128xf32>
    %cst_12 = arith.constant dense<0.000000e+00> : vector<128xf32>
    %21 = vector.multi_reduction <add>, %20, %cst_12 [0] : vector<10x128xf32> to vector<128xf32>
    %22 = vector.shape_cast %21 : vector<128xf32> to vector<1x128xf32>
    %23 = vector.broadcast %7 : vector<1x1xf32> to vector<1x128xf32>
    %24 = arith.addf %22, %23 : vector<1x128xf32>
    %c0_13 = arith.constant 0 : index
    %c0_14 = arith.constant 0 : index
    %25 = vector.load %arg4[%c0_13, %c0_14] : memref<1x128xf32, #tpu.memory_space<vmem>>, vector<1x128xf32>
    tpu.vector_store %arg4[%c0_13, %c0_14], %24 {strides = array<i32>} : memref<1x128xf32, #tpu.memory_space<vmem>>, vector<1x128xf32>,
    return
  }
  func.func @transform_0(%arg0: i32) -> (i32, i32) {
    %c0_i32 = arith.constant 0 : i32
    %c0_i32_0 = arith.constant 0 : i32
    return %arg0, %c0_i32 : i32, i32
  }
  func.func @transform_1(%arg0: i32) -> (i32, i32) {
    %c0_i32 = arith.constant 0 : i32
    %c0_i32_0 = arith.constant 0 : i32
    %c0_i32_1 = arith.constant 0 : i32
    return %c0_i32, %c0_i32_0 : i32, i32
  }
  func.func @transform_2(%arg0: i32) -> (i32, i32) {
    %c0_i32 = arith.constant 0 : i32
    %c0_i32_0 = arith.constant 0 : i32
    %c0_i32_1 = arith.constant 0 : i32
    return %c0_i32, %c0_i32_0 : i32, i32
  }
  func.func @transform_3(%arg0: i32) -> (i32, i32) {
    %c0_i32 = arith.constant 0 : i32
    %c0_i32_0 = arith.constant 0 : i32
    return %c0_i32, %arg0 : i32, i32
  }
}

</mosaic_0001>

<bundles_post_ra>
// kernel: tpu_custom_call.1
= control target key start
LH: loop header
LB: loop body
LE: loop exit
PB: predicated region body
PF: predicated region fallthrough
CT: control target
= control target key end

     0   :  { %8 = vsyncpa [#allocation3], 0  ;;  %s479_s0 = inlined_call_operand.hbm [shape: f32[8,8], index: 0, kind: input, shape index: {}]   ;;  %s480_s1 = inlined_call_operand.hbm [shape: bf16[16,128], index: 1, kind: input, shape index: {}]   ;;  %s481_s2 = inlined_call_operand.hbm [shape: f32[16,128], index: 2, kind: input, shape index: {}]   ;;  %s482_s3 = inlined_call_operand.hbm [shape: f32[1,128], index: 3, kind: output, shape index: {}]  }
   0x1   :  { %9 = vsyncpa [#allocation6], 0 }
   0x2   :  { %10 = vsyncpa [#allocation4], 0 }
   0x3   :  { %15 = vsyncadd [#allocation3], 1920  ;;  %s423_s12 = smov [#allocation5]  }
   0x4   :  { %s28_s13 = sshll.u32 %s423_s12, 4  ;;  %s29_s13 = int_to_ptr.vmem [resolvable:$true] %s28_s13 }
   0x5   :  { %s345_s14 = scalar_lea.vmem %s29_s13, 128  ;;  %p350_p1 = scmp.lt.s32.totalorder %s29_s13, %s29_s13 }
   0x6   :  { %p346_p0 = scmp.ne.s32.totalorder %s29_s13, %s345_s14  ;;  %p351_p2 = scmp.lt.s32.totalorder %s345_s14, %s345_s14 }
   0x8   :  { %p352_p3 = por %p351_p2, %p350_p1 }
   0xa   :  { %p353_p4 = pnand %p352_p3, %p346_p0 }
   0xc   :  { %356 = shalt.err (!%p353_p4)
}
   0xd   :  { %s424_s15 = smov 64   ;;  %s425_s16 = smov 4  }
   0xe   :  { %34 = dma.hbm_to_vmem [thread:$0]  %s480_s1, 128, %s29_s13, [#allocation6], %s424_s15, %s424_s15, %s425_s16  }
   0xf   :  { %s426_s19 = smov [#allocation2]  }
  0x10   :  { %s16_s20 = sshll.u32 %s426_s19, 4  ;;  %s17_s20 = int_to_ptr.vmem [resolvable:$true] %s16_s20 }
  0x11   :  { %s365_s21 = scalar_lea.vmem %s17_s20, 128  ;;  %s369_s22 = scalar_lea.vmem %s17_s20, 2048 }
  0x12   :  { %p366_p5 = scmp.ne.s32.totalorder %s17_s20, %s365_s21  ;;  %p370_p6 = scmp.lt.s32.totalorder %s17_s20, %s17_s20 }
  0x13   :  { %p371_p7 = scmp.lt.s32.totalorder %s369_s22, %s365_s21 }
  0x15   :  { %p372_p8 = por %p371_p7, %p370_p6 }
  0x17   :  { %p373_p9 = pnand %p372_p8, %p366_p5 }
  0x19   :  { %376 = shalt.err (!%p373_p9)
}
  0x1a   :  { %s427_s23 = smov 128   ;;  %s428_s24 = smov 8  }
  0x1b   :  { %22 = dma.hbm_to_vmem [thread:$0]  %s479_s0, 128, %s17_s20, [#allocation3], %s427_s23, %s427_s23, %s428_s24  }
  0x1c   :  { %s429_s27 = smov [#allocation7]  }
  0x1d   :  { %s40_s28 = sshll.u32 %s429_s27, 4  ;;  %s41_s28 = int_to_ptr.vmem [resolvable:$true] %s40_s28 }
  0x1e   :  { %s385_s1 = scalar_lea.vmem %s41_s28, 256  ;;  %p390_p11 = scmp.lt.s32.totalorder %s41_s28, %s41_s28 }
  0x1f   :  { %p386_p10 = scmp.ne.s32.totalorder %s41_s28, %s385_s1  ;;  %p391_p12 = scmp.lt.s32.totalorder %s385_s1, %s385_s1 }
  0x21   :  { %p392_p13 = por %p391_p12, %p390_p11 }
  0x23   :  { %p393_p0 = pnand %p392_p13, %p386_p10 }
  0x25   :  { %396 = shalt.err (!%p393_p0)
}
  0x26   :  { %46 = dma.hbm_to_vmem [thread:$0]  %s481_s2, 256, %s41_s28, [#allocation6], %s427_s23, %s427_s23, %s428_s24  }
  0x27   :  { %417 = dma.done.wait [#allocation3], 2048  }
  0x28   :  { %418 = vsyncadd [#allocation3], 4294965248 }
  0x29   :  { %419 = dma.done.wait [#allocation6], 384  }
  0x2a   :  { %420 = vsyncadd [#allocation6], 4294966912  ;;  %v430_v0 = vmov 0.0   ;;  %vm431_vm0 = vmmov 0   ;;  %v432_v1 = vmov 0   ;;  %v71_v2 = vld [vmem:[#allocation2 + $0x70] sm:$0xff] }
  0x2b   :  { %290 = vmatprep.subr.bf16.mxu0 %v430_v0  ;;  %306 = vmatprep.mubr.msk.bf16.mxu0 %vm431_vm0, %v430_v0  ;;  %v72_v3 = vld [vmem:[#allocation2 + $0x78] sm:$0xff]  ;;  %vm101_vm1 = vcmask 64512   ;;  %v69_v5 = vld [vmem:[#allocation2 + $0x60] sm:$0xff]  ;;  %v70_v6 = vld [vmem:[#allocation2 + $0x68] sm:$0xff]  ;;  %s433_s0 = smov 120   ;;  %v434_v37 = vmov 1  }
  0x2c   :  { %331 = vset.pattern.permute.xlu0 %v432_v1  ;;  %310 = vmatprep.subr.bf16.mxu1 %v430_v0  ;;  %v80_v4 = vpack.c.bf16 %v72_v3, %v71_v2  ;;  %v79_v8 = vpack.c.bf16 %v70_v6, %v69_v5  ;;  %v336_v9 = vld [vmem:[#allocation5] sm:$0x1f]   ;;  %v83_v10 = vld [vmem:[#allocation7] sm:$0xff]  ;;  %v84_v11 = vld [vmem:[#allocation7 + $0x8] sm:$0x3]  ;;  %v435_v39 = vmov 2  }
  0x2d   :  { %312 = vmatprep.mubr.msk.bf16.mxu1 %vm431_vm0, %v430_v0  ;;  %88 = vperm.xlu0 %331, %v83_v10   ;;  %v67_v13 = vld [vmem:[#allocation2 + $0x50] sm:$0xff]  ;;  %v68_v14 = vld [vmem:[#allocation2 + $0x58] sm:$0xff]  ;;  %v65_v17 = vld [vmem:[#allocation2 + $0x40] sm:$0xff]  ;;  %v436_v40 = vmov 3   ;;  %vm187_vm2 = vcmask 1044480   ;;  %vm183_vm3 = vcmask 80896  }
  0x2e   :  { %v127_v7 = vsel %vm101_vm1, %v80_v4, 0  ;;  %181 = vrot.lane.b32.xlu1 %v336_v9, %s433_s0  ;;  %v124_v12 = vsel %vm101_vm1, %v79_v8, 0  ;;  %v78_v15 = vpack.c.bf16 %v68_v14, %v67_v13  ;;  %v66_v18 = vld [vmem:[#allocation2 + $0x48] sm:$0xff]  ;;  %v63_v21 = vld [vmem:[#allocation2 + $0x30] sm:$0xff]  ;;  %v64_v22 = vld [vmem:[#allocation2 + $0x38] sm:$0xff]  ;;  %vm244_vm4 = vcmask 1041408  }
  0x2f   :  { %291 = vmatpush3.bf16.xpose.msra.mxu0 %v127_v7  ;;  %v77_v19 = vpack.c.bf16 %v66_v18, %v65_v17  ;;  %v76_v23 = vpack.c.bf16 %v64_v22, %v63_v21  ;;  %v61_v25 = vld [vmem:[#allocation2 + $0x20] sm:$0xff]  ;;  %v62_v26 = vld [vmem:[#allocation2 + $0x28] sm:$0xff]  ;;  %v59_v29 = vld [vmem:[#allocation2 + $0x10] sm:$0xff]  ;;  %332 = vset.pattern.permute.xlu1 %v434_v37  ;;  %s437_s2 = smov [#allocation8]  }
  0x30   :  { %292 = vmatprep.subr.bf16.mxu0 %v430_v0  ;;  %v121_v16 = vsel %vm101_vm1, %v78_v15, 0  ;;  %v75_v27 = vpack.c.bf16 %v62_v26, %v61_v25  ;;  %v60_v30 = vld [vmem:[#allocation2 + $0x18] sm:$0xff]  ;;  %v57_v33 = vld [vmem:[#allocation2] sm:$0xff]  ;;  %v58_v34 = vld [vmem:[#allocation2 + $0x8] sm:$0xff]  ;;  %s266_s4 = sshll.u32 %s437_s2, 4  ;;  %s267_s4 = int_to_ptr.vmem [resolvable:$true] %s266_s4 }
  0x31   :  { %93 = vperm.xlu0 %331, %v84_v11   ;;  %v118_v20 = vsel %vm101_vm1, %v77_v19, 0  ;;  %v115_v24 = vsel %vm101_vm1, %v76_v23, 0  ;;  %v74_v31 = vpack.c.bf16 %v60_v30, %v59_v29  ;;  %v73_v35 = vpack.c.bf16 %v58_v34, %v57_v33  ;;  %v85_v38 = vld [vmem:[#allocation7] sm:$0x1]  ;;  %s397_s5 = scalar_lea.vmem %s267_s4, 16  ;;  %s401_s6 = scalar_lea.vmem %s267_s4, 32 }
  0x32   :  { %v112_v28 = vsel %vm101_vm1, %v75_v27, 0  ;;  %178 = vperm.xlu1 %332, %v84_v11   ;;  %p398_p1 = scmp.ne.s32.totalorder %s267_s4, %s397_s5  ;;  %p402_p2 = scmp.lt.s32.totalorder %s267_s4, %s267_s4 }
  0x33   :  { %v109_v32 = vsel %vm101_vm1, %v74_v31, 0  ;;  %v106_v36 = vsel %vm101_vm1, %v73_v35, 0  ;;  %p403_p3 = scmp.lt.s32.totalorder %s401_s6, %s397_s5 }
  0x35   :  { %333 = vset.pattern.permute.xlu0 %v434_v37  ;;  %p404_p4 = por %p403_p3, %p402_p2 }
  0x36   :  { %174 = vperm.xlu0 %333, %v83_v10   ;;  %334 = vset.pattern.permute.xlu1 %v435_v39 }
  0x37   :  { %293 = vmatpush3.bf16.xpose.msra.mxu0 %v124_v12  ;;  %239 = vperm.xlu1 %334, %v84_v11   ;;  %p405_p5 = pnand %p404_p4, %p398_p1 }
  0x38   :  { %294 = vmatprep.subr.bf16.mxu0 %v430_v0 }
  0x3a   :  { %335 = vset.pattern.permute.xlu0 %v436_v40 }
  0x3b   :  { %255 = vperm.xlu0 %335, %v85_v38   ;;  %235 = vperm.xlu1 %334, %v83_v10  }
  0x3f   :  { %295 = vmatpush3.bf16.xpose.msra.mxu0 %v121_v16 }
  0x40   :  { %296 = vmatprep.subr.bf16.mxu0 %v430_v0 }
  0x47   :  { %297 = vmatpush3.bf16.xpose.msra.mxu0 %v118_v20 }
  0x48   :  { %298 = vmatprep.subr.bf16.mxu0 %v430_v0 }
  0x4f   :  { %299 = vmatpush3.bf16.xpose.msra.mxu0 %v115_v24 }
  0x50   :  { %300 = vmatprep.subr.bf16.mxu0 %v430_v0 }
  0x57   :  { %301 = vmatpush3.bf16.xpose.msra.mxu0 %v112_v28 }
  0x58   :  { %302 = vmatprep.subr.bf16.mxu0 %v430_v0 }
  0x5f   :  { %303 = vmatpush3.bf16.xpose.msra.mxu0 %v109_v32 }
  0x60   :  { %304 = vmatprep.subr.bf16.mxu0 %v430_v0 }
  0x67   :  { %305 = vmatpush3.bf16.xpose.msra.mxu0 %v106_v36 }
  0x6e   :  { %307 = vmatmul.mubr.msk.bf16.vlgmr.msra.gmra.mxu0 %vm101_vm1, %v336_v9 }
  0xa0   :  { %v182_v53 = vpop.permute.xlu1 %181 }
  0xa8   :  { %v89_v41 = vpop.permute.xlu0 %88 }
  0xac   :  { %v94_v45 = vpop.permute.xlu0 %93 }
  0xad   :  { %v179_v54 = vpop.permute.xlu1 %178 }
  0xb1   :  { %v175_v55 = vpop.permute.xlu0 %174 }
  0xb2   :  { %v240_v57 = vpop.permute.xlu1 %239 }
  0xb6   :  { %v236_v0 = vpop.permute.xlu1 %235  ;;  %v256_v11 = vpop.permute.xlu0 %255 }
 0x12e   :  { %v163_v42 = vpop.f32.mrf.mxu0 }
 0x12f   :  { %v164_v44 = vadd.f32 %v163_v42, %v89_v41 }
 0x130   :  { %v308_v43 = vpop.f32.mrf.mxu0 }
 0x131   :  { %v170_v49 = vmax.f32 %v164_v44, 0.0 }
 0x132   :  { %v166_v46 = vpop.f32.mrf.mxu0 }
 0x133   :  { %v167_v47 = vadd.f32 %v166_v46, %v94_v45 }
 0x134   :  { %v309_v48 = vpop.f32.mrf.mxu0 }
 0x135   :  { %v171_v50 = vmax.f32 %v167_v47, 0.0 }
 0x137   :  { %v172_v51 = vpack.c.bf16 %v171_v50, %v170_v49 }
 0x139   :  { %v189_v52 = vsel %vm187_vm2, %v172_v51, 0 }
 0x13a   :  { %311 = vmatpush3.bf16.msra.mxu1 %v189_v52 }
 0x13d   :  { %313 = vmatmul.mubr.msk.bf16.vlgmr.msra.gmra.mxu1 %vm183_vm3, %v182_v53 }
 0x1fd   :  { %v225_v56 = vpop.f32.mrf.mxu1 }
 0x1fe   :  { %v226_v58 = vadd.f32 %v225_v56, %v175_v55 }
 0x1ff   :  { %v314_v59 = vpop.f32.mrf.mxu1 }
 0x200   :  { %v232_v62 = vmax.f32 %v226_v58, 0.0 }
 0x201   :  { %v228_v60 = vpop.f32.mrf.mxu1 }
 0x202   :  { %v229_v61 = vadd.f32 %v228_v60, %v179_v54  ;;  %v242_v3 = vmul.f32 %v236_v0, %v232_v62 }
 0x203   :  { %v315_v63 = vpop.f32.mrf.mxu1 }
 0x204   :  { %v233_v1 = vmax.f32 %v229_v61, 0.0 }
 0x206   :  { %v243_v2 = vmul.f32 %v240_v57, %v233_v1 }
 0x208   :  { %v245_v4 = vsel %vm244_vm4, %v243_v2, 0.0 }
 0x209   :  { %v246_v5 = vadd.f32 %v245_v4, %v242_v3 }
 0x20b   :  { %v247_v6 = vrot.slane %v246_v5, 4 }
 0x20d   :  { %v248_v7 = vadd.f32 %v247_v6, %v246_v5 }
 0x20f   :  { %v249_v8 = vrot.slane %v248_v7, 2 }
 0x211   :  { %v250_v9 = vadd.f32 %v249_v8, %v248_v7 }
 0x213   :  { %v251_v10 = vrot.slane %v250_v9, 1 }
 0x215   :  { %v252_v12 = vadd.f32 %v251_v10, %v250_v9 }
 0x217   :  { %v258_v13 = vadd.f32 %v256_v11, %v252_v12 }
 0x219   :  { %259 = vst [vmem:[#allocation8] sm:$0x1] %v258_v13 }
 0x21a   :  { %408 = shalt.err (!%p405_p5)
}
 0x21b   :  { %269 = dma.vmem_to_hbm [thread:$0]  %s267_s4, 16, %s482_s3, [#allocation4]  }
 0x21c   :  { %421 = dma.done.wait [#allocation4], 16  }
 0x21d   :  { %422 = vsyncadd [#allocation4], 4294967280 }
 0x21e   :  { %273 = vsyncpa [#allocation3], 1 }
 0x21f   :  { %274 = vsyncpa [#allocation6], 1 }
 0x220   :  { %275 = vsyncpa [#allocation4], 1 }

</bundles_post_ra>
